<compile_context>
chip_gen: v6e
topology: v6e:2x2x1
jax: 0.10.0
libtpu: 0.0.40
codegen_flags: <defaults>
</compile_context>

<pallas_src>
import math
import functools
import jax
import jax.numpy as jnp
from jax import lax
from jax.experimental import pallas as pl
from jax.experimental.pallas import tpu as pltpu


def _round_up(x, m):
    return ((x + m - 1) // m) * m


def _proj_kernel(x_ref, w_ref, b_ref, o_ref):
    # x_ref: (tm, d_model)   w_ref: (tn, d_model)   b_ref: (1, tn)   o_ref: (tm, tn)
    acc = lax.dot_general(
        x_ref[...], w_ref[...],
        dimension_numbers=(((1,), (1,)), ((), ())),   # contract d_model of both
        preferred_element_type=jnp.float32,
    )
    o_ref[...] = (acc + b_ref[...]).astype(o_ref.dtype)


def _choose_tiles(M, vocab, d_model, bytes_per, tm, tn, budget_bytes):
    """Aligned tiles (sublane=8, lane=128) that fit a double-buffered VMEM budget."""
    tm_eff = tm if M >= tm else max(8, _round_up(M, 8))
    tn_eff = tn if vocab >= tn else _round_up(vocab, 128)

    def tiles_bytes(a, b):
        # x tile + w tile + bias tile + out tile, double-buffered by the pipeline.
        return 2 * (a * d_model + b * d_model + b + a * b) * bytes_per

    while tiles_bytes(tm_eff, tn_eff) > budget_bytes and (tm_eff > 8 or tn_eff > 128):
        if tm_eff >= tn_eff and tm_eff > 8:
            tm_eff = max(8, _round_up(tm_eff // 2, 8))
        elif tn_eff > 128:
            tn_eff = max(128, _round_up(tn_eff // 2, 128))
        else:
            tm_eff = max(8, _round_up(tm_eff // 2, 8))
    return tm_eff, tn_eff


def projection_layer(x, weight, bias, *, tm=256, tn=512):
    """x: (B, S, d_model); weight: (vocab, d_model) [PyTorch layout]; bias: (vocab,)."""
    B, S, d_model = x.shape
    vocab = weight.shape[0]
    M = B * S
    dtype = x.dtype
    bytes_per = jnp.dtype(dtype).itemsize

    # ~40 MiB tile budget: safely under v5e/v6e 128 MiB and v7x 64 MiB physical VMEM.
    tm_eff, tn_eff = _choose_tiles(M, vocab, d_model, bytes_per, tm, tn, 40 << 20)

    M_p = _round_up(M, tm_eff)
    V_p = _round_up(vocab, tn_eff)   # keep the output lane-dense (multiple of 128)

    x2d = x.reshape(M, d_model)
    if M_p != M:
        x2d = jnp.pad(x2d, ((0, M_p - M), (0, 0)))
    w = weight
    b = bias
    if V_p != vocab:
        w = jnp.pad(w, ((0, V_p - vocab), (0, 0)))
        b = jnp.pad(b, ((0, V_p - vocab),))
    b2d = b.reshape(1, V_p)

    m_tiles = M_p // tm_eff
    v_tiles = V_p // tn_eff

    # Pick the grid ordering that minimizes total HBM input traffic:
    #   A) vocab outer, M inner  -> weight fetched once, x refetched v_tiles times
    #   B) M outer, vocab inner  -> x fetched once, weight refetched m_tiles times
    w_elems = vocab * d_model
    x_elems = M * d_model
    reuse_weight = (w_elems + x_elems * v_tiles) <= (x_elems + w_elems * m_tiles)

    if reuse_weight:
        grid = (v_tiles, m_tiles)
        x_map = lambda j, i: (i, 0)
        w_map = lambda j, i: (j, 0)
        b_map = lambda j, i: (0, j)
        o_map = lambda j, i: (i, j)
    else:
        grid = (m_tiles, v_tiles)
        x_map = lambda i, j: (i, 0)
        w_map = lambda i, j: (j, 0)
        b_map = lambda i, j: (0, j)
        o_map = lambda i, j: (i, j)

    # Advisory cost for the XLA scheduler.
    cost = pl.CostEstimate(
        flops=2 * M * d_model * vocab,
        transcendentals=0,
        bytes_accessed=(M * d_model + vocab * d_model + vocab + M * vocab) * bytes_per,
    )

    # Raise the scoped VMEM limit above the 16/32 MiB default, keep headroom.
    tile_bytes = 2 * (tm_eff * d_model + tn_eff * d_model + tn_eff + tm_eff * tn_eff) * bytes_per
    vmem_limit = int(min(max(tile_bytes + (4 << 20), 32 << 20), 48 << 20))

    # TODO(synk): for very large d_model add a K (d_model) grid axis with an f32
    # VMEM accumulator; untiled K is fine for typical projection heads.

    out2d = pl.pallas_call(
        _proj_kernel,
        out_shape=jax.ShapeDtypeStruct((M_p, V_p), dtype),
        grid_spec=pltpu.PrefetchScalarGridSpec(
            num_scalar_prefetch=0,
            grid=grid,
            in_specs=[
                pl.BlockSpec((tm_eff, d_model), x_map),   # activations
                pl.BlockSpec((tn_eff, d_model), w_map),   # weight (vocab, d_model)
                pl.BlockSpec((1, tn_eff),       b_map),   # bias row
            ],
            out_specs=pl.BlockSpec((tm_eff, tn_eff), o_map),
        ),
        compiler_params=pltpu.CompilerParams(
            dimension_semantics=("parallel", "parallel"),
            vmem_limit_bytes=vmem_limit,
        ),
        cost_estimate=cost,
    )(x2d, w, b2d)

    if M_p != M or V_p != vocab:
        out2d = out2d[:M, :vocab]
    return out2d.reshape(B, S, vocab)


if __name__ == "__main__":
    # Small shapes consistent with the module: (batch, seq, d_model) -> (batch, seq, vocab)
    batch, seq, d_model, vocab_size = 2, 8, 32, 64

    key = jax.random.PRNGKey(0)
    kx, kw, kb = jax.random.split(key, 3)

    x = jax.random.normal(kx, (batch, seq, d_model), dtype=jnp.float32)

    # Deterministic init matching nn.Linear default: U(-1/sqrt(d_model), 1/sqrt(d_model))
    bound = 1.0 / math.sqrt(d_model)
    weight = jax.random.uniform(kw, (vocab_size, d_model), jnp.float32, -bound, bound)
    bias = jax.random.uniform(kb, (vocab_size,), jnp.float32, -bound, bound)

    proj = jax.jit(functools.partial(projection_layer, tm=256, tn=512))
    out = proj(x, weight, bias)
    jax.block_until_ready(out)

    # Reference check against plain JAX
    ref = x @ weight.T + bias
    assert out.shape == (batch, seq, vocab_size)
    assert jnp.allclose(out, ref, atol=1e-4, rtol=1e-4)

    print("KERNEL_OK")
</pallas_src>

<mosaic_0001>
module attributes {stable_mosaic.version = 11 : i64} {
  func.func @_proj_kernel(%arg0: i32, %arg1: i32, %arg2: memref<16x32xf32, #tpu.memory_space<vmem>>, %arg3: memref<128x32xf32, #tpu.memory_space<vmem>>, %arg4: memref<1x128xf32, #tpu.memory_space<vmem>>, %arg5: memref<16x128xf32, #tpu.memory_space<vmem>>) attributes {dimension_semantics = [#tpu.dimension_semantics<parallel>, #tpu.dimension_semantics<parallel>], iteration_bounds = array<i64: 1, 1>, scalar_prefetch = 0 : i64, scratch_operands = 0 : i64, tpu.core_type = #tpu.core_type<tc>, window_params = [{transform_indices = @transform_0, window_bounds = array<i64: 16, 32>}, {transform_indices = @transform_1, window_bounds = array<i64: 128, 32>}, {transform_indices = @transform_2, window_bounds = array<i64: 1, 128>}, {transform_indices = @transform_3, window_bounds = array<i64: 16, 128>}]} {
    %c0 = arith.constant 0 : index
    %c0_0 = arith.constant 0 : index
    %0 = vector.load %arg2[%c0, %c0_0] : memref<16x32xf32, #tpu.memory_space<vmem>>, vector<16x32xf32>
    %c0_1 = arith.constant 0 : index
    %c0_2 = arith.constant 0 : index
    %1 = vector.load %arg3[%c0_1, %c0_2] : memref<128x32xf32, #tpu.memory_space<vmem>>, vector<128x32xf32>
    %cst = arith.constant dense<0.000000e+00> : vector<16x128xf32>
    %2 = tpu.matmul %0, %1, %cst {dimension_numbers = #tpu.dot_dimension_numbers<[1], [1], [0], [0], [0, 0, 1, 0], [], []>} : vector<16x32xf32>, vector<128x32xf32>, vector<16x128xf32> -> vector<16x128xf32>
    %c0_3 = arith.constant 0 : index
    %c0_4 = arith.constant 0 : index
    %3 = vector.load %arg4[%c0_3, %c0_4] : memref<1x128xf32, #tpu.memory_space<vmem>>, vector<1x128xf32>
    %4 = vector.broadcast %3 : vector<1x128xf32> to vector<16x128xf32>
    %5 = arith.addf %2, %4 : vector<16x128xf32>
    %c0_5 = arith.constant 0 : index
    %c0_6 = arith.constant 0 : index
    %6 = vector.load %arg5[%c0_5, %c0_6] : memref<16x128xf32, #tpu.memory_space<vmem>>, vector<16x128xf32>
    tpu.vector_store %arg5[%c0_5, %c0_6], %5 {strides = array<i32>} : memref<16x128xf32, #tpu.memory_space<vmem>>, vector<16x128xf32>,
    return
  }
  func.func @transform_0(%arg0: i32, %arg1: i32) -> (i32, i32) {
    %c0_i32 = arith.constant 0 : i32
    %c0_i32_0 = arith.constant 0 : i32
    return %arg1, %c0_i32 : i32, i32
  }
  func.func @transform_1(%arg0: i32, %arg1: i32) -> (i32, i32) {
    %c0_i32 = arith.constant 0 : i32
    %c0_i32_0 = arith.constant 0 : i32
    return %arg0, %c0_i32 : i32, i32
  }
  func.func @transform_2(%arg0: i32, %arg1: i32) -> (i32, i32) {
    %c0_i32 = arith.constant 0 : i32
    %c0_i32_0 = arith.constant 0 : i32
    return %c0_i32, %arg0 : i32, i32
  }
  func.func @transform_3(%arg0: i32, %arg1: i32) -> (i32, i32) {
    %c0_i32 = arith.constant 0 : i32
    return %arg1, %arg0 : i32, i32
  }
}

</mosaic_0001>

<bundles_post_ra>
// kernel: projection_layer.1
= control target key start
LH: loop header
LB: loop body
LE: loop exit
PB: predicated region body
PF: predicated region fallthrough
CT: control target
= control target key end

     0   :  { %vm39_vm0 = vcmask 261120   ;;  %s364_s1 = inlined_call_operand.vmem [shape: f32[128,32], index: 1, kind: input, shape index: {}]   ;;  %s365_s0 = inlined_call_operand.vmem [shape: f32[16,32], index: 0, kind: input, shape index: {}]   ;;  %s366_s2 = inlined_call_operand.vmem [shape: f32[1,128], index: 2, kind: input, shape index: {}]   ;;  %s367_s3 = inlined_call_operand.vmem [shape: f32[16,128], index: 3, kind: output, shape index: {}]  }
   0x1   :  { %v31_v0 = vld [vmem:[%s364_s1 + $0x78] sm:$0xff]  ;;  %v30_v1 = vld [vmem:[%s364_s1 + $0x70] sm:$0xff]  ;;  %v29_v2 = vld [vmem:[%s364_s1 + $0x68] sm:$0xff] }
   0x2   :  { %212 = vmatprep.subr.msk.mxu0 %vm39_vm0, %v31_v0  ;;  %v14_v3 = vld [vmem:[%s365_s0] sm:$0xff]  ;;  %v27_v5 = vld [vmem:[%s364_s1 + $0x58] sm:$0xff]  ;;  %v26_v6 = vld [vmem:[%s364_s1 + $0x50] sm:$0xff] }
   0x3   :  { %213 = vmatpush3.xpose.msk.msra.mxu0 %vm39_vm0, %v31_v0  ;;  %244 = vmatprep.mubr.msk.f32.mxu0 %vm39_vm0, %v14_v3  ;;  %v28_v4 = vld [vmem:[%s364_s1 + $0x60] sm:$0xff]  ;;  %v25_v7 = vld [vmem:[%s364_s1 + $0x48] sm:$0xff]  ;;  %v23_v9 = vld [vmem:[%s364_s1 + $0x38] sm:$0xff] }
   0x4   :  { %214 = vmatprep.subr.msk.mxu0 %vm39_vm0, %v30_v1  ;;  %v24_v8 = vld [vmem:[%s364_s1 + $0x40] sm:$0xff]  ;;  %v22_v10 = vld [vmem:[%s364_s1 + $0x30] sm:$0xff]  ;;  %v21_v11 = vld [vmem:[%s364_s1 + $0x28] sm:$0xff] }
   0x5   :  { %v20_v12 = vld [vmem:[%s364_s1 + $0x20] sm:$0xff]  ;;  %v19_v13 = vld [vmem:[%s364_s1 + $0x18] sm:$0xff]  ;;  %v18_v14 = vld [vmem:[%s364_s1 + $0x10] sm:$0xff] }
   0x6   :  { %v17_v15 = vld [vmem:[%s364_s1 + $0x8] sm:$0xff]  ;;  %v16_v16 = vld [vmem:[%s364_s1] sm:$0xff] }
   0x7   :  { %215 = vmatpush3.xpose.msk.msra.mxu0 %vm39_vm0, %v30_v1  ;;  %v15_v17 = vld [vmem:[%s365_s0 + $0x8] sm:$0xff]  ;;  %v175_v18 = vld [vmem:[%s366_s2] ss:$0 sm:$0xff] }
   0x8   :  { %216 = vmatprep.subr.msk.mxu0 %vm39_vm0, %v29_v2 }
   0xb   :  { %217 = vmatpush3.xpose.msk.msra.mxu0 %vm39_vm0, %v29_v2 }
   0xc   :  { %218 = vmatprep.subr.msk.mxu0 %vm39_vm0, %v28_v4 }
   0xf   :  { %219 = vmatpush3.xpose.msk.msra.mxu0 %vm39_vm0, %v28_v4 }
  0x10   :  { %220 = vmatprep.subr.msk.mxu0 %vm39_vm0, %v27_v5 }
  0x13   :  { %221 = vmatpush3.xpose.msk.msra.mxu0 %vm39_vm0, %v27_v5 }
  0x14   :  { %222 = vmatprep.subr.msk.mxu0 %vm39_vm0, %v26_v6 }
  0x17   :  { %223 = vmatpush3.xpose.msk.msra.mxu0 %vm39_vm0, %v26_v6 }
  0x18   :  { %224 = vmatprep.subr.msk.mxu0 %vm39_vm0, %v25_v7 }
  0x1b   :  { %225 = vmatpush3.xpose.msk.msra.mxu0 %vm39_vm0, %v25_v7 }
  0x1c   :  { %226 = vmatprep.subr.msk.mxu0 %vm39_vm0, %v24_v8 }
  0x1f   :  { %227 = vmatpush3.xpose.msk.msra.mxu0 %vm39_vm0, %v24_v8 }
  0x20   :  { %228 = vmatprep.subr.msk.mxu0 %vm39_vm0, %v23_v9 }
  0x23   :  { %229 = vmatpush3.xpose.msk.msra.mxu0 %vm39_vm0, %v23_v9 }
  0x24   :  { %230 = vmatprep.subr.msk.mxu0 %vm39_vm0, %v22_v10 }
  0x27   :  { %231 = vmatpush3.xpose.msk.msra.mxu0 %vm39_vm0, %v22_v10 }
  0x28   :  { %232 = vmatprep.subr.msk.mxu0 %vm39_vm0, %v21_v11 }
  0x2b   :  { %233 = vmatpush3.xpose.msk.msra.mxu0 %vm39_vm0, %v21_v11 }
  0x2c   :  { %234 = vmatprep.subr.msk.mxu0 %vm39_vm0, %v20_v12 }
  0x2f   :  { %235 = vmatpush3.xpose.msk.msra.mxu0 %vm39_vm0, %v20_v12 }
  0x30   :  { %236 = vmatprep.subr.msk.mxu0 %vm39_vm0, %v19_v13 }
  0x33   :  { %237 = vmatpush3.xpose.msk.msra.mxu0 %vm39_vm0, %v19_v13 }
  0x34   :  { %238 = vmatprep.subr.msk.mxu0 %vm39_vm0, %v18_v14 }
  0x37   :  { %239 = vmatpush3.xpose.msk.msra.mxu0 %vm39_vm0, %v18_v14 }
  0x38   :  { %240 = vmatprep.subr.msk.mxu0 %vm39_vm0, %v17_v15 }
  0x3b   :  { %241 = vmatpush3.xpose.msk.msra.mxu0 %vm39_vm0, %v17_v15 }
  0x3c   :  { %242 = vmatprep.subr.msk.mxu0 %vm39_vm0, %v16_v16 }
  0x3f   :  { %243 = vmatpush3.xpose.msk.msra.mxu0 %vm39_vm0, %v16_v16 }
  0x42   :  { %245 = vmatmul.mubr.msk.f32.vlgmr.msra.gmra.mxu0 %vm39_vm0, %v15_v17 }
 0x102   :  { %v246_v19 = vpop.f32.mrf.mxu0 }
 0x103   :  { %v166_v20 = vadd.f32 %v246_v19, %v175_v18 }
 0x104   :  { %v160_v21 = vpop.f32.mrf.mxu0 }
 0x105   :  { %170 = vst [vmem:[%s367_s3 + $0x8] sm:$0xff] %v166_v20  ;;  %v161_v22 = vadd.f32 %v175_v18, %v160_v21 }
 0x107   :  { %169 = vst [vmem:[%s367_s3] sm:$0xff] %v161_v22 }

</bundles_post_ra>
